<compile_context>
chip_gen: v7x
topology: tpu7x:2x2x1
jax: 0.10.0
libtpu: 0.0.40
codegen_flags: <defaults>
</compile_context>

<pallas_src>
import functools

import jax
import jax.numpy as jnp
import numpy as np
from jax.experimental import pallas as pl
from jax.experimental.pallas import tpu as pltpu


# ----------------------------- Pallas kernel --------------------------------
def _gs_aggregate_kernel(in_ref, out_ref, *, length_cost):
    """GS aggregation for one batch tile.

    in_ref : (3, L, gtile, 128) f32 block, batch folded onto sublanes+lanes.
             channel 0 = per-step task loss   loss(receiver_output[:, t], labels)
             channel 1 = per-step EOS prob    message[:, t, 0]
             channel 2 = per-step aux ("acc")
    out_ref: (3, gtile, 128) f32 block.
             channel 0 = per-sample expected loss (incl. length cost)
             channel 1 = expected message length
             channel 2 = EOS-mass-weighted aux ("acc")
    """
    max_len = in_ref.shape[1]
    gt, lanes = in_ref.shape[2], in_ref.shape[3]

    not_eosed = jnp.ones((gt, lanes), jnp.float32)
    loss = jnp.zeros((gt, lanes), jnp.float32)
    explen = jnp.zeros((gt, lanes), jnp.float32)
    auxagg = jnp.zeros((gt, lanes), jnp.float32)

    # Unrolled over the small, static max message length; the `not_eosed`
    # recurrence is inherently sequential.  Each step is a handful of dense
    # (gtile, 128) VPU ops fed by per-step vector loads straight from the ref.
    sl = av = None
    for step in range(max_len):
        sl = in_ref[0, step, :, :]          # (gt, 128)
        eo = in_ref[1, step, :, :]
        av = in_ref[2, step, :, :]
        add_mask = eo * not_eosed
        loss = loss + sl * add_mask
        explen = explen + (1.0 + step) * add_mask
        auxagg = auxagg + av * add_mask
        not_eosed = not_eosed * (1.0 - eo)

    # Leftover probability mass gets the last step's loss/aux and length L
    # (mirrors the post-loop terms in the PyTorch module).
    loss = loss + sl * not_eosed
    explen = explen + float(max_len) * not_eosed
    auxagg = auxagg + av * not_eosed

    # length_cost * (1+step) summed over the EOS mass == length_cost * explen.
    loss = loss + length_cost * explen

    out_ref[0, :, :] = loss
    out_ref[1, :, :] = explen
    out_ref[2, :, :] = auxagg


def _pick_gtile(G):
    """Pick the sublane tile over the G = B // 128 batch-group axis.

    Prefer >=2 grid programs (v7x has 2 TensorCores; "parallel" semantics can
    only shard the axis if there are >=2 programs) while keeping the sublane
    dim a multiple of 8 and the blocks fat (per-grid-step overhead, not VMEM,
    is the limiter on v5e/v6e: even (3, L, 64, 128) double-buffered is ~MiB).
    """
    for gt in (64, 32, 16, 8):
        if G % gt == 0 and G // gt >= 2:
            return gt
    return G  # small batch: single full block, grid=(1,)


def gs_aggregate_pallas(packed, *, length_cost, gtile=None):
    """packed: (3, L, G, 128) f32 — [step_loss, eos_prob, aux], batch = G*128."""
    n_chan, L, G, lanes = packed.shape
    assert n_chan == 3 and lanes == 128
    if gtile is None:
        gtile = _pick_gtile(G)
    if G % gtile != 0 or not (gtile % 8 == 0 or gtile == G):
        raise ValueError(f"invalid gtile={gtile} for G={G} "
                         "(must divide G and be a multiple of 8 or equal G)")
    grid = (G // gtile,)

    kernel = functools.partial(_gs_aggregate_kernel,
                               length_cost=float(length_cost))

    out = pl.pallas_call(
        kernel,
        out_shape=jax.ShapeDtypeStruct((3, G, 128), jnp.float32),
        grid=grid,
        in_specs=[pl.BlockSpec((3, L, gtile, 128), lambda i: (0, 0, i, 0))],
        out_specs=pl.BlockSpec((3, gtile, 128), lambda i: (0, i, 0)),
        # Batch tiles are fully independent (the wrapper does the final mean),
        # so the axis can be sharded across both TensorCores on v7x.
        compiler_params=pltpu.CompilerParams(
            dimension_semantics=("parallel",)),
    )(packed)

    B = G * 128
    per_loss = out[0].reshape(B)
    expected_length = out[1].reshape(B)
    aux_agg = out[2].reshape(B)
    return per_loss, expected_length, aux_agg


# -------------------------- pure-JAX reference path --------------------------
def _gs_aggregate_ref(step_loss_lb, eos_lb, aux_lb, length_cost):
    """Reference / small-batch path.  Inputs are step-major (L, B) f32."""
    L, B = step_loss_lb.shape
    not_eosed = jnp.ones((B,), jnp.float32)
    loss = jnp.zeros((B,), jnp.float32)
    explen = jnp.zeros((B,), jnp.float32)
    auxagg = jnp.zeros((B,), jnp.float32)
    for step in range(L):
        eo = eos_lb[step]
        add_mask = eo * not_eosed
        loss = loss + (step_loss_lb[step] + length_cost * (1.0 + step)) * add_mask
        explen = explen + (1.0 + step) * add_mask
        auxagg = auxagg + aux_lb[step] * add_mask
        not_eosed = not_eosed * (1.0 - eo)
    loss = loss + (step_loss_lb[-1] + length_cost * float(L)) * not_eosed
    explen = explen + float(L) * not_eosed
    auxagg = auxagg + aux_lb[-1] * not_eosed
    return loss, explen, auxagg


# --------------------- plain-JAX glue: sender / receiver --------------------
# TODO(synk): sender/receiver/loss are external nn.Modules in the PyTorch
# module; small deterministic GS-style stand-ins are used here (softmax in
# place of gumbel-softmax sampling noise).
def make_gs_agents(key, n_feat, hidden, vocab, max_len, n_out, temperature=1.0):
    ks = jax.random.split(key, 4)
    params = {
        "W_h": jax.random.normal(ks[0], (n_feat, hidden)) * 0.1,
        "W_step": jax.random.normal(ks[1], (max_len, hidden, vocab)) * 0.1,
        "emb": jax.random.normal(ks[2], (vocab, hidden)) * 0.1,
        "W_r": jax.random.normal(ks[3], (hidden, n_out)) * 0.1,
    }

    def sender(sender_input, aux_input=None):
        h = jnp.tanh(sender_input @ params["W_h"])                   # (B, H)
        logits = jnp.einsum("bh,lhv->blv", h, params["W_step"])      # (B, L, V)
        return jax.nn.softmax(logits / temperature, axis=-1)         # relaxed one-hots

    def receiver(message, receiver_input=None, aux_input=None):
        emb = jnp.einsum("blv,vh->blh", message, params["emb"])      # (B, L, H)
        denom = jnp.arange(1, message.shape[1] + 1,
                           dtype=jnp.float32)[None, :, None]
        state = jnp.cumsum(emb, axis=1) / denom                      # causal prefix mean
        return jnp.einsum("blh,hc->blc", jnp.tanh(state), params["W_r"])

    def loss_fn(sender_input, message, receiver_input, receiver_output,
                labels, aux_input):
        # Emits per-step loss/acc STEP-MAJOR (L, B) so the downstream Pallas
        # aggregation consumes them without materializing (B, L) transposes:
        # the (L, B) order falls out of the einsum / compare output ordering
        # and fuses with the producers.
        C = receiver_output.shape[-1]
        logp = jax.nn.log_softmax(receiver_output, axis=-1)           # (B, L, C)
        onehot = jax.nn.one_hot(labels, C, dtype=jnp.float32)         # (B, C)
        nll_lb = -jnp.einsum("blc,bc->lb", logp, onehot)              # (L, B)
        pred = jnp.argmax(receiver_output, axis=-1)                   # (B, L)
        acc_lb = (pred.T == labels[None, :]).astype(jnp.float32)      # (L, B)
        return nll_lb, {"acc": acc_lb}

    return sender, receiver, loss_fn


# ------------------------------- forward pass --------------------------------
def sender_receiver_rnn_gs_forward(sender, receiver, loss_fn, sender_input,
                                   labels, *, length_cost=0.0,
                                   use_pallas=None, gtile=None):
    # channel_type=None -> no noise channel applied (matches this config).
    message = sender(sender_input, None)                     # (B, L, V)
    receiver_output = receiver(message, None, None)          # (B, L, C)
    step_loss_lb, step_aux = loss_fn(sender_input, message, None,
                                     receiver_output, labels, None)
    acc_lb = step_aux["acc"]                                  # (L, B)
    eos_lb = message[:, :, 0].T                               # (L, B), tiny slice
    B = sender_input.shape[0]
    L = message.shape[1]

    if use_pallas is None:
        # The aggregation is a few-hundred-flop reduction; only amortize the
        # pallas_call launch + DMA setup at realistic batch sizes.
        use_pallas = (B % 128 == 0) and (B >= 1024)
    if use_pallas and B % 128 != 0:
        # The packed (G, 128) layout needs a lane-aligned batch; fall back.
        use_pallas = False

    if use_pallas:
        G = B // 128
        # Single stacked operand: one contiguous DMA per grid step, batch
        # folded onto (sublane, lane) = (G, 128).  The reshape is free
        # (contiguous); the stack fuses with the step-major producers.
        packed = jnp.stack([step_loss_lb, eos_lb, acc_lb],
                           axis=0).reshape(3, L, G, 128)
        per_loss, expected_length, acc_agg = gs_aggregate_pallas(
            packed, length_cost=length_cost, gtile=gtile)
    else:
        per_loss, expected_length, acc_agg = _gs_aggregate_ref(
            step_loss_lb, eos_lb, acc_lb, length_cost)

    optimized_loss = jnp.mean(per_loss)                      # loss.mean()
    aux_info = {"acc": acc_agg, "length": expected_length}
    interaction = {
        "sender_input": sender_input,
        "labels": labels,
        "message": message,
        "receiver_output": receiver_output,
        "message_length": expected_length,
        "aux": aux_info,
    }
    return optimized_loss, interaction


# --------------------------------- main --------------------------------------
if __name__ == "__main__":
    # Small model dims; B is a lane multiple and large enough that the packed
    # layout gives G=16 batch groups -> gtile=8 -> a 2-program grid, so the
    # blocked path, index maps and "parallel" sharding are all exercised.
    B, L, V, H, F, C = 2048, 8, 10, 32, 16, 5

    key = jax.random.PRNGKey(0)
    k_in, k_lab, k_par = jax.random.split(key, 3)
    sender_input = jax.random.normal(k_in, (B, F), dtype=jnp.float32)
    labels = jax.random.randint(k_lab, (B,), 0, C)

    sender, receiver, loss_fn = make_gs_agents(k_par, F, H, V, L, C)

    opt_loss, interaction = sender_receiver_rnn_gs_forward(
        sender, receiver, loss_fn, sender_input, labels,
        length_cost=0.01, use_pallas=True)

    # Pure-JAX reference (same math) for a numerical sanity check.
    ref_loss, ref_inter = sender_receiver_rnn_gs_forward(
        sender, receiver, loss_fn, sender_input, labels,
        length_cost=0.01, use_pallas=False)

    jax.block_until_ready(opt_loss)
    jax.block_until_ready(interaction["message_length"])

    assert np.allclose(np.asarray(opt_loss), np.asarray(ref_loss),
                       rtol=1e-4, atol=1e-5), (opt_loss, ref_loss)
    assert np.allclose(np.asarray(interaction["message_length"]),
                       np.asarray(ref_inter["message_length"]),
                       rtol=1e-4, atol=1e-5)
    assert np.allclose(np.asarray(interaction["aux"]["acc"]),
                       np.asarray(ref_inter["aux"]["acc"]),
                       rtol=1e-4, atol=1e-5)
    print("KERNEL_OK")
</pallas_src>

<mosaic_0001>
module attributes {stable_mosaic.version = 11 : i64} {
  func.func @_gs_aggregate_kernel(%arg0: i32, %arg1: memref<3x8x8x128xf32, #tpu.memory_space<vmem>>, %arg2: memref<3x8x128xf32, #tpu.memory_space<vmem>>) attributes {dimension_semantics = [#tpu.dimension_semantics<parallel>], iteration_bounds = array<i64: 2>, scalar_prefetch = 0 : i64, scratch_operands = 0 : i64, tpu.core_type = #tpu.core_type<tc>, window_params = [{transform_indices = @transform_0, window_bounds = array<i64: 3, 8, 8, 128>}, {transform_indices = @transform_1, window_bounds = array<i64: 3, 8, 128>}]} {
    %cst = arith.constant 1.000000e+00 : f32
    %0 = vector.broadcast %cst : f32 to vector<8x128xf32>
    %cst_0 = arith.constant 0.000000e+00 : f32
    %1 = vector.broadcast %cst_0 : f32 to vector<8x128xf32>
    %cst_1 = arith.constant 0.000000e+00 : f32
    %2 = vector.broadcast %cst_1 : f32 to vector<8x128xf32>
    %cst_2 = arith.constant 0.000000e+00 : f32
    %3 = vector.broadcast %cst_2 : f32 to vector<8x128xf32>
    %c0 = arith.constant 0 : index
    %c0_3 = arith.constant 0 : index
    %c0_4 = arith.constant 0 : index
    %c0_5 = arith.constant 0 : index
    %4 = vector.load %arg1[%c0, %c0_3, %c0_4, %c0_5] : memref<3x8x8x128xf32, #tpu.memory_space<vmem>>, vector<1x1x8x128xf32>
    %5 = vector.shape_cast %4 : vector<1x1x8x128xf32> to vector<8x128xf32>
    %c1 = arith.constant 1 : index
    %c0_6 = arith.constant 0 : index
    %c0_7 = arith.constant 0 : index
    %c0_8 = arith.constant 0 : index
    %6 = vector.load %arg1[%c1, %c0_6, %c0_7, %c0_8] : memref<3x8x8x128xf32, #tpu.memory_space<vmem>>, vector<1x1x8x128xf32>
    %7 = vector.shape_cast %6 : vector<1x1x8x128xf32> to vector<8x128xf32>
    %c2 = arith.constant 2 : index
    %c0_9 = arith.constant 0 : index
    %c0_10 = arith.constant 0 : index
    %c0_11 = arith.constant 0 : index
    %8 = vector.load %arg1[%c2, %c0_9, %c0_10, %c0_11] : memref<3x8x8x128xf32, #tpu.memory_space<vmem>>, vector<1x1x8x128xf32>
    %9 = vector.shape_cast %8 : vector<1x1x8x128xf32> to vector<8x128xf32>
    %10 = arith.mulf %7, %0 : vector<8x128xf32>
    %11 = arith.mulf %5, %10 : vector<8x128xf32>
    %12 = arith.addf %1, %11 : vector<8x128xf32>
    %cst_12 = arith.constant 1.000000e+00 : f32
    %13 = vector.broadcast %cst_12 : f32 to vector<8x128xf32>
    %14 = arith.mulf %13, %10 : vector<8x128xf32>
    %15 = arith.addf %2, %14 : vector<8x128xf32>
    %16 = arith.mulf %9, %10 : vector<8x128xf32>
    %17 = arith.addf %3, %16 : vector<8x128xf32>
    %cst_13 = arith.constant 1.000000e+00 : f32
    %18 = vector.broadcast %cst_13 : f32 to vector<8x128xf32>
    %19 = arith.subf %18, %7 : vector<8x128xf32>
    %20 = arith.mulf %0, %19 : vector<8x128xf32>
    %c0_14 = arith.constant 0 : index
    %c1_15 = arith.constant 1 : index
    %c0_16 = arith.constant 0 : index
    %c0_17 = arith.constant 0 : index
    %21 = vector.load %arg1[%c0_14, %c1_15, %c0_16, %c0_17] : memref<3x8x8x128xf32, #tpu.memory_space<vmem>>, vector<1x1x8x128xf32>
    %22 = vector.shape_cast %21 : vector<1x1x8x128xf32> to vector<8x128xf32>
    %c1_18 = arith.constant 1 : index
    %c1_19 = arith.constant 1 : index
    %c0_20 = arith.constant 0 : index
    %c0_21 = arith.constant 0 : index
    %23 = vector.load %arg1[%c1_18, %c1_19, %c0_20, %c0_21] : memref<3x8x8x128xf32, #tpu.memory_space<vmem>>, vector<1x1x8x128xf32>
    %24 = vector.shape_cast %23 : vector<1x1x8x128xf32> to vector<8x128xf32>
    %c2_22 = arith.constant 2 : index
    %c1_23 = arith.constant 1 : index
    %c0_24 = arith.constant 0 : index
    %c0_25 = arith.constant 0 : index
    %25 = vector.load %arg1[%c2_22, %c1_23, %c0_24, %c0_25] : memref<3x8x8x128xf32, #tpu.memory_space<vmem>>, vector<1x1x8x128xf32>
    %26 = vector.shape_cast %25 : vector<1x1x8x128xf32> to vector<8x128xf32>
    %27 = arith.mulf %24, %20 : vector<8x128xf32>
    %28 = arith.mulf %22, %27 : vector<8x128xf32>
    %29 = arith.addf %12, %28 : vector<8x128xf32>
    %cst_26 = arith.constant 2.000000e+00 : f32
    %30 = vector.broadcast %cst_26 : f32 to vector<8x128xf32>
    %31 = arith.mulf %30, %27 : vector<8x128xf32>
    %32 = arith.addf %15, %31 : vector<8x128xf32>
    %33 = arith.mulf %26, %27 : vector<8x128xf32>
    %34 = arith.addf %17, %33 : vector<8x128xf32>
    %cst_27 = arith.constant 1.000000e+00 : f32
    %35 = vector.broadcast %cst_27 : f32 to vector<8x128xf32>
    %36 = arith.subf %35, %24 : vector<8x128xf32>
    %37 = arith.mulf %20, %36 : vector<8x128xf32>
    %c0_28 = arith.constant 0 : index
    %c2_29 = arith.constant 2 : index
    %c0_30 = arith.constant 0 : index
    %c0_31 = arith.constant 0 : index
    %38 = vector.load %arg1[%c0_28, %c2_29, %c0_30, %c0_31] : memref<3x8x8x128xf32, #tpu.memory_space<vmem>>, vector<1x1x8x128xf32>
    %39 = vector.shape_cast %38 : vector<1x1x8x128xf32> to vector<8x128xf32>
    %c1_32 = arith.constant 1 : index
    %c2_33 = arith.constant 2 : index
    %c0_34 = arith.constant 0 : index
    %c0_35 = arith.constant 0 : index
    %40 = vector.load %arg1[%c1_32, %c2_33, %c0_34, %c0_35] : memref<3x8x8x128xf32, #tpu.memory_space<vmem>>, vector<1x1x8x128xf32>
    %41 = vector.shape_cast %40 : vector<1x1x8x128xf32> to vector<8x128xf32>
    %c2_36 = arith.constant 2 : index
    %c2_37 = arith.constant 2 : index
    %c0_38 = arith.constant 0 : index
    %c0_39 = arith.constant 0 : index
    %42 = vector.load %arg1[%c2_36, %c2_37, %c0_38, %c0_39] : memref<3x8x8x128xf32, #tpu.memory_space<vmem>>, vector<1x1x8x128xf32>
    %43 = vector.shape_cast %42 : vector<1x1x8x128xf32> to vector<8x128xf32>
    %44 = arith.mulf %41, %37 : vector<8x128xf32>
    %45 = arith.mulf %39, %44 : vector<8x128xf32>
    %46 = arith.addf %29, %45 : vector<8x128xf32>
    %cst_40 = arith.constant 3.000000e+00 : f32
    %47 = vector.broadcast %cst_40 : f32 to vector<8x128xf32>
    %48 = arith.mulf %47, %44 : vector<8x128xf32>
    %49 = arith.addf %32, %48 : vector<8x128xf32>
    %50 = arith.mulf %43, %44 : vector<8x128xf32>
    %51 = arith.addf %34, %50 : vector<8x128xf32>
    %cst_41 = arith.constant 1.000000e+00 : f32
    %52 = vector.broadcast %cst_41 : f32 to vector<8x128xf32>
    %53 = arith.subf %52, %41 : vector<8x128xf32>
    %54 = arith.mulf %37, %53 : vector<8x128xf32>
    %c0_42 = arith.constant 0 : index
    %c3 = arith.constant 3 : index
    %c0_43 = arith.constant 0 : index
    %c0_44 = arith.constant 0 : index
    %55 = vector.load %arg1[%c0_42, %c3, %c0_43, %c0_44] : memref<3x8x8x128xf32, #tpu.memory_space<vmem>>, vector<1x1x8x128xf32>
    %56 = vector.shape_cast %55 : vector<1x1x8x128xf32> to vector<8x128xf32>
    %c1_45 = arith.constant 1 : index
    %c3_46 = arith.constant 3 : index
    %c0_47 = arith.constant 0 : index
    %c0_48 = arith.constant 0 : index
    %57 = vector.load %arg1[%c1_45, %c3_46, %c0_47, %c0_48] : memref<3x8x8x128xf32, #tpu.memory_space<vmem>>, vector<1x1x8x128xf32>
    %58 = vector.shape_cast %57 : vector<1x1x8x128xf32> to vector<8x128xf32>
    %c2_49 = arith.constant 2 : index
    %c3_50 = arith.constant 3 : index
    %c0_51 = arith.constant 0 : index
    %c0_52 = arith.constant 0 : index
    %59 = vector.load %arg1[%c2_49, %c3_50, %c0_51, %c0_52] : memref<3x8x8x128xf32, #tpu.memory_space<vmem>>, vector<1x1x8x128xf32>
    %60 = vector.shape_cast %59 : vector<1x1x8x128xf32> to vector<8x128xf32>
    %61 = arith.mulf %58, %54 : vector<8x128xf32>
    %62 = arith.mulf %56, %61 : vector<8x128xf32>
    %63 = arith.addf %46, %62 : vector<8x128xf32>
    %cst_53 = arith.constant 4.000000e+00 : f32
    %64 = vector.broadcast %cst_53 : f32 to vector<8x128xf32>
    %65 = arith.mulf %64, %61 : vector<8x128xf32>
    %66 = arith.addf %49, %65 : vector<8x128xf32>
    %67 = arith.mulf %60, %61 : vector<8x128xf32>
    %68 = arith.addf %51, %67 : vector<8x128xf32>
    %cst_54 = arith.constant 1.000000e+00 : f32
    %69 = vector.broadcast %cst_54 : f32 to vector<8x128xf32>
    %70 = arith.subf %69, %58 : vector<8x128xf32>
    %71 = arith.mulf %54, %70 : vector<8x128xf32>
    %c0_55 = arith.constant 0 : index
    %c4 = arith.constant 4 : index
    %c0_56 = arith.constant 0 : index
    %c0_57 = arith.constant 0 : index
    %72 = vector.load %arg1[%c0_55, %c4, %c0_56, %c0_57] : memref<3x8x8x128xf32, #tpu.memory_space<vmem>>, vector<1x1x8x128xf32>
    %73 = vector.shape_cast %72 : vector<1x1x8x128xf32> to vector<8x128xf32>
    %c1_58 = arith.constant 1 : index
    %c4_59 = arith.constant 4 : index
    %c0_60 = arith.constant 0 : index
    %c0_61 = arith.constant 0 : index
    %74 = vector.load %arg1[%c1_58, %c4_59, %c0_60, %c0_61] : memref<3x8x8x128xf32, #tpu.memory_space<vmem>>, vector<1x1x8x128xf32>
    %75 = vector.shape_cast %74 : vector<1x1x8x128xf32> to vector<8x128xf32>
    %c2_62 = arith.constant 2 : index
    %c4_63 = arith.constant 4 : index
    %c0_64 = arith.constant 0 : index
    %c0_65 = arith.constant 0 : index
    %76 = vector.load %arg1[%c2_62, %c4_63, %c0_64, %c0_65] : memref<3x8x8x128xf32, #tpu.memory_space<vmem>>, vector<1x1x8x128xf32>
    %77 = vector.shape_cast %76 : vector<1x1x8x128xf32> to vector<8x128xf32>
    %78 = arith.mulf %75, %71 : vector<8x128xf32>
    %79 = arith.mulf %73, %78 : vector<8x128xf32>
    %80 = arith.addf %63, %79 : vector<8x128xf32>
    %cst_66 = arith.constant 5.000000e+00 : f32
    %81 = vector.broadcast %cst_66 : f32 to vector<8x128xf32>
    %82 = arith.mulf %81, %78 : vector<8x128xf32>
    %83 = arith.addf %66, %82 : vector<8x128xf32>
    %84 = arith.mulf %77, %78 : vector<8x128xf32>
    %85 = arith.addf %68, %84 : vector<8x128xf32>
    %cst_67 = arith.constant 1.000000e+00 : f32
    %86 = vector.broadcast %cst_67 : f32 to vector<8x128xf32>
    %87 = arith.subf %86, %75 : vector<8x128xf32>
    %88 = arith.mulf %71, %87 : vector<8x128xf32>
    %c0_68 = arith.constant 0 : index
    %c5 = arith.constant 5 : index
    %c0_69 = arith.constant 0 : index
    %c0_70 = arith.constant 0 : index
    %89 = vector.load %arg1[%c0_68, %c5, %c0_69, %c0_70] : memref<3x8x8x128xf32, #tpu.memory_space<vmem>>, vector<1x1x8x128xf32>
    %90 = vector.shape_cast %89 : vector<1x1x8x128xf32> to vector<8x128xf32>
    %c1_71 = arith.constant 1 : index
    %c5_72 = arith.constant 5 : index
    %c0_73 = arith.constant 0 : index
    %c0_74 = arith.constant 0 : index
    %91 = vector.load %arg1[%c1_71, %c5_72, %c0_73, %c0_74] : memref<3x8x8x128xf32, #tpu.memory_space<vmem>>, vector<1x1x8x128xf32>
    %92 = vector.shape_cast %91 : vector<1x1x8x128xf32> to vector<8x128xf32>
    %c2_75 = arith.constant 2 : index
    %c5_76 = arith.constant 5 : index
    %c0_77 = arith.constant 0 : index
    %c0_78 = arith.constant 0 : index
    %93 = vector.load %arg1[%c2_75, %c5_76, %c0_77, %c0_78] : memref<3x8x8x128xf32, #tpu.memory_space<vmem>>, vector<1x1x8x128xf32>
    %94 = vector.shape_cast %93 : vector<1x1x8x128xf32> to vector<8x128xf32>
    %95 = arith.mulf %92, %88 : vector<8x128xf32>
    %96 = arith.mulf %90, %95 : vector<8x128xf32>
    %97 = arith.addf %80, %96 : vector<8x128xf32>
    %cst_79 = arith.constant 6.000000e+00 : f32
    %98 = vector.broadcast %cst_79 : f32 to vector<8x128xf32>
    %99 = arith.mulf %98, %95 : vector<8x128xf32>
    %100 = arith.addf %83, %99 : vector<8x128xf32>
    %101 = arith.mulf %94, %95 : vector<8x128xf32>
    %102 = arith.addf %85, %101 : vector<8x128xf32>
    %cst_80 = arith.constant 1.000000e+00 : f32
    %103 = vector.broadcast %cst_80 : f32 to vector<8x128xf32>
    %104 = arith.subf %103, %92 : vector<8x128xf32>
    %105 = arith.mulf %88, %104 : vector<8x128xf32>
    %c0_81 = arith.constant 0 : index
    %c6 = arith.constant 6 : index
    %c0_82 = arith.constant 0 : index
    %c0_83 = arith.constant 0 : index
    %106 = vector.load %arg1[%c0_81, %c6, %c0_82, %c0_83] : memref<3x8x8x128xf32, #tpu.memory_space<vmem>>, vector<1x1x8x128xf32>
    %107 = vector.shape_cast %106 : vector<1x1x8x128xf32> to vector<8x128xf32>
    %c1_84 = arith.constant 1 : index
    %c6_85 = arith.constant 6 : index
    %c0_86 = arith.constant 0 : index
    %c0_87 = arith.constant 0 : index
    %108 = vector.load %arg1[%c1_84, %c6_85, %c0_86, %c0_87] : memref<3x8x8x128xf32, #tpu.memory_space<vmem>>, vector<1x1x8x128xf32>
    %109 = vector.shape_cast %108 : vector<1x1x8x128xf32> to vector<8x128xf32>
    %c2_88 = arith.constant 2 : index
    %c6_89 = arith.constant 6 : index
    %c0_90 = arith.constant 0 : index
    %c0_91 = arith.constant 0 : index
    %110 = vector.load %arg1[%c2_88, %c6_89, %c0_90, %c0_91] : memref<3x8x8x128xf32, #tpu.memory_space<vmem>>, vector<1x1x8x128xf32>
    %111 = vector.shape_cast %110 : vector<1x1x8x128xf32> to vector<8x128xf32>
    %112 = arith.mulf %109, %105 : vector<8x128xf32>
    %113 = arith.mulf %107, %112 : vector<8x128xf32>
    %114 = arith.addf %97, %113 : vector<8x128xf32>
    %cst_92 = arith.constant 7.000000e+00 : f32
    %115 = vector.broadcast %cst_92 : f32 to vector<8x128xf32>
    %116 = arith.mulf %115, %112 : vector<8x128xf32>
    %117 = arith.addf %100, %116 : vector<8x128xf32>
    %118 = arith.mulf %111, %112 : vector<8x128xf32>
    %119 = arith.addf %102, %118 : vector<8x128xf32>
    %cst_93 = arith.constant 1.000000e+00 : f32
    %120 = vector.broadcast %cst_93 : f32 to vector<8x128xf32>
    %121 = arith.subf %120, %109 : vector<8x128xf32>
    %122 = arith.mulf %105, %121 : vector<8x128xf32>
    %c0_94 = arith.constant 0 : index
    %c7 = arith.constant 7 : index
    %c0_95 = arith.constant 0 : index
    %c0_96 = arith.constant 0 : index
    %123 = vector.load %arg1[%c0_94, %c7, %c0_95, %c0_96] : memref<3x8x8x128xf32, #tpu.memory_space<vmem>>, vector<1x1x8x128xf32>
    %124 = vector.shape_cast %123 : vector<1x1x8x128xf32> to vector<8x128xf32>
    %c1_97 = arith.constant 1 : index
    %c7_98 = arith.constant 7 : index
    %c0_99 = arith.constant 0 : index
    %c0_100 = arith.constant 0 : index
    %125 = vector.load %arg1[%c1_97, %c7_98, %c0_99, %c0_100] : memref<3x8x8x128xf32, #tpu.memory_space<vmem>>, vector<1x1x8x128xf32>
    %126 = vector.shape_cast %125 : vector<1x1x8x128xf32> to vector<8x128xf32>
    %c2_101 = arith.constant 2 : index
    %c7_102 = arith.constant 7 : index
    %c0_103 = arith.constant 0 : index
    %c0_104 = arith.constant 0 : index
    %127 = vector.load %arg1[%c2_101, %c7_102, %c0_103, %c0_104] : memref<3x8x8x128xf32, #tpu.memory_space<vmem>>, vector<1x1x8x128xf32>
    %128 = vector.shape_cast %127 : vector<1x1x8x128xf32> to vector<8x128xf32>
    %129 = arith.mulf %126, %122 : vector<8x128xf32>
    %130 = arith.mulf %124, %129 : vector<8x128xf32>
    %131 = arith.addf %114, %130 : vector<8x128xf32>
    %cst_105 = arith.constant 8.000000e+00 : f32
    %132 = vector.broadcast %cst_105 : f32 to vector<8x128xf32>
    %133 = arith.mulf %132, %129 : vector<8x128xf32>
    %134 = arith.addf %117, %133 : vector<8x128xf32>
    %135 = arith.mulf %128, %129 : vector<8x128xf32>
    %136 = arith.addf %119, %135 : vector<8x128xf32>
    %cst_106 = arith.constant 1.000000e+00 : f32
    %137 = vector.broadcast %cst_106 : f32 to vector<8x128xf32>
    %138 = arith.subf %137, %126 : vector<8x128xf32>
    %139 = arith.mulf %122, %138 : vector<8x128xf32>
    %140 = arith.mulf %124, %139 : vector<8x128xf32>
    %141 = arith.addf %131, %140 : vector<8x128xf32>
    %cst_107 = arith.constant 8.000000e+00 : f32
    %142 = vector.broadcast %cst_107 : f32 to vector<8x128xf32>
    %143 = arith.mulf %142, %139 : vector<8x128xf32>
    %144 = arith.addf %134, %143 : vector<8x128xf32>
    %145 = arith.mulf %128, %139 : vector<8x128xf32>
    %146 = arith.addf %136, %145 : vector<8x128xf32>
    %cst_108 = arith.constant 0.00999999977 : f32
    %147 = vector.broadcast %cst_108 : f32 to vector<8x128xf32>
    %148 = arith.mulf %147, %144 : vector<8x128xf32>
    %149 = arith.addf %141, %148 : vector<8x128xf32>
    %c0_109 = arith.constant 0 : index
    %c0_110 = arith.constant 0 : index
    %c0_111 = arith.constant 0 : index
    %150 = vector.load %arg2[%c0_109, %c0_110, %c0_111] : memref<3x8x128xf32, #tpu.memory_space<vmem>>, vector<1x8x128xf32>
    %151 = vector.shape_cast %150 : vector<1x8x128xf32> to vector<8x128xf32>
    %152 = vector.shape_cast %149 : vector<8x128xf32> to vector<1x8x128xf32>
    tpu.vector_store %arg2[%c0_109, %c0_110, %c0_111], %152 {strides = array<i32>} : memref<3x8x128xf32, #tpu.memory_space<vmem>>, vector<1x8x128xf32>,
    %c1_112 = arith.constant 1 : index
    %c0_113 = arith.constant 0 : index
    %c0_114 = arith.constant 0 : index
    %153 = vector.load %arg2[%c1_112, %c0_113, %c0_114] : memref<3x8x128xf32, #tpu.memory_space<vmem>>, vector<1x8x128xf32>
    %154 = vector.shape_cast %153 : vector<1x8x128xf32> to vector<8x128xf32>
    %155 = vector.shape_cast %144 : vector<8x128xf32> to vector<1x8x128xf32>
    tpu.vector_store %arg2[%c1_112, %c0_113, %c0_114], %155 {strides = array<i32>} : memref<3x8x128xf32, #tpu.memory_space<vmem>>, vector<1x8x128xf32>,
    %c2_115 = arith.constant 2 : index
    %c0_116 = arith.constant 0 : index
    %c0_117 = arith.constant 0 : index
    %156 = vector.load %arg2[%c2_115, %c0_116, %c0_117] : memref<3x8x128xf32, #tpu.memory_space<vmem>>, vector<1x8x128xf32>
    %157 = vector.shape_cast %156 : vector<1x8x128xf32> to vector<8x128xf32>
    %158 = vector.shape_cast %146 : vector<8x128xf32> to vector<1x8x128xf32>
    tpu.vector_store %arg2[%c2_115, %c0_116, %c0_117], %158 {strides = array<i32>} : memref<3x8x128xf32, #tpu.memory_space<vmem>>, vector<1x8x128xf32>,
    return
  }
  func.func @transform_0(%arg0: i32) -> (i32, i32, i32, i32) {
    %c0_i32 = arith.constant 0 : i32
    %c0_i32_0 = arith.constant 0 : i32
    %c0_i32_1 = arith.constant 0 : i32
    %c0_i32_2 = arith.constant 0 : i32
    return %c0_i32, %c0_i32_0, %arg0, %c0_i32_1 : i32, i32, i32, i32
  }
  func.func @transform_1(%arg0: i32) -> (i32, i32, i32) {
    %c0_i32 = arith.constant 0 : i32
    %c0_i32_0 = arith.constant 0 : i32
    %c0_i32_1 = arith.constant 0 : i32
    return %c0_i32, %arg0, %c0_i32_0 : i32, i32, i32
  }
}

</mosaic_0001>

<bundles_post_ra>
// kernel: tpu_custom_call.1
= control target key start
LH: loop header
LB: loop body
LE: loop exit
PB: predicated region body
PF: predicated region fallthrough
CT: control target
= control target key end

     0   :  { %6 = vsyncpa [#allocation3], 0  ;;  %s738_s0 = inlined_call_operand.hbm [shape: f32[3,8,16,128], index: 0, kind: input, shape index: {}]   ;;  %s739_s1 = inlined_call_operand.hbm [shape: f32[3,16,128], index: 1, kind: output, shape index: {}]  }
   0x1   :  { %8 = vsyncpa [#allocation3 + $0x1], 0 }
   0x2   :  { %9 = vsyncpa [#allocation4], 0 }
   0x3   :  { %11 = vsyncpa [#allocation4 + $0x1], 0  ;;  %s553_s6 = smov 0   ;;  %s555_s7 = smov 0  }
   0x4   :  { %s557_s8 = smov 0   ;;  %s559_s9 = smov 0  }
   0x5 LB: > { %s574_s10 = sadd.s32 4294967295, %s533_s9   ;;  %s349_s11 = sadd.s32 4294967294, %s533_s9   ;;  %s533_s9 = sphi %s559_s9, %s752_s9   ;;  %s529_s8 = sphi %s557_s8, %s751_s8   ;;  %s525_s7 = sphi %s555_s7, %s750_s7   ;;  %s521_s6 = sphi %s553_s6, %s749_s6  }
   0x6   : > { %s578_s12 = sadd.s32 1, %s533_s9   ;;  %s24_s13 = sadd.s32 1, %s529_s8 }
   0x7   : > { %s21_s14 = ssub.s32 %s533_s9, %s578_s12  ;;  %p31_p0 = scmp.ne.s32.totalorder %s529_s8, %s525_s7 }
   0x8   : > { %p22_p1 = scmp.eq.s32.totalorder %s21_s14, 0  ;;  %p32_p2 = scmp.eq.s32.totalorder %s533_s9, 0 }
   0x9   : > { %p37_p3 = scmp.ne.s32.totalorder %s525_s7, %s521_s6  ;;  %p38_p4 = scmp.eq.s32.totalorder %s574_s10, 0 }
   0xa   : > { %s590_s15 = scalar_select %p22_p1, %s529_s8, %s24_s13  }
   0xb   : > { %p33_p5 = por %p32_p2, %p31_p0  ;;  %p592_p6 = por %p38_p4, %p37_p3 }
   0xc   : > { %p61_p7 = scmp.eq.s32.totalorder %s574_s10, 1  ;;  %p67_p8 = scmp.eq.s32.totalorder %s349_s11, 1 }
   0xd   : > { %p397_p10 = scmp.lt.s32.totalorder %s533_s9, 2  ;;  %s87_s19 = sand.u32 1, %s529_s8  }
   0xe   : > { %p599_p11 = por %p61_p7, %p31_p0  ;;  %p603_p12 = por %p67_p8, %p37_p3 }
   0xf   : > { %s352_s20 = sshll.u32 %s533_s9, 7  ;;  %s382_s21 = smul.u32 192, %s87_s19 }
  0x10   : > { %s742_s17 = scalar_select %p599_p11, 1, 0 }
  0x11   : > { %s743_s18 = scalar_select %p603_p12, 1, 0 }
  0x12   : > { %s612_s24 = scalar_lea.hbm %s738_s0, %s352_s20  ;;  %p614_p13 = pnand %p397_p10, %p33_p5 }
  0x13   : > { %s91_s26 = scalar_lea.vmem [#allocation2], %s382_s21  ;;  %s621_s28 = scalar_lea.sflag [#allocation3], %s87_s19 }
  0x14   : > { %s97_s27 = sshll.u32 %s91_s26, 4  ;;  %s437_s29 = scalar_lea.hbm %s612_s24, 3072  ;;  %s618_s27 = int_to_ptr.vmem [resolvable:$true] %s97_s27 }
  0x15   : > { %p438_p1 = scmp.ne.s32.totalorder %s612_s24, %s437_s29  ;;  %p439_p2 = pneg %p614_p13 }
  0x16   : > { %s442_s3 = scalar_lea.hbm %s738_s0, 6144  ;;  %p443_p5 = scmp.lt.u32.totalorder %s612_s24, %s738_s0 }
  0x17   : > { %p440_p3 = pnand %p439_p2, %p438_p1  ;;  %p444_p7 = scmp.lt.u32.totalorder %s442_s3, %s437_s29 }
  0x18   : > { %p446_p10 = scmp.lt.u32.totalorder %s437_s29, %s612_s24 }
  0x19   : > { %p441_p4 = pneg %p440_p3  ;;  %p445_p8 = por %p444_p7, %p443_p5 }
  0x1b   : > { %p447_p9 = por %p446_p10, %p445_p8 }
  0x1d   : > { %p448_p0 = pnand %p447_p9, %p441_p4 }
  0x1f   : > { %451 = shalt.err (!%p448_p0)
}
  0x20   : > { %s452_s11 = scalar_lea.vmem %s618_s27, 3072  ;;  %s535_s13 = smov [#allocation2]  }
  0x21   : > { %p453_p1 = scmp.ne.s32.totalorder %s618_s27, %s452_s11  ;;  %s457_s14 = sshll.u32 %s535_s13, 4  ;;  %s458_s14 = int_to_ptr.vmem [resolvable:$false] %s457_s14 }
  0x22   : > { %s459_s19 = scalar_lea.vmem %s458_s14, 6144  ;;  %p460_p11 = scmp.lt.s32.totalorder %s618_s27, %s458_s14 }
  0x23   : > { %p455_p3 = pnand %p453_p1, %p439_p2  ;;  %p461_p5 = scmp.lt.s32.totalorder %s459_s19, %s452_s11 }
  0x25   : > { %p456_p12 = pneg %p455_p3  ;;  %p462_p7 = por %p461_p5, %p460_p11 }
  0x27   : > { %p463_p8 = pnand %p462_p7, %p456_p12 }
  0x29   : > { %466 = shalt.err (!%p463_p8)
}
  0x2a   : > { %s536_s20 = smov 256   ;;  %s537_s21 = smov 128  }
  0x2b   : > { %s538_s22 = smov 8   ;;  %p105_p9 = scmp.lt.s32.totalorder %s533_s9, 3 }
  0x2c   : > { %392 = dma.hbm_to_vmem [thread:$0]  (!%p614_p13), %s612_s24, 3072, %s618_s27, %s621_s28, %s536_s20, %s537_s21, %s538_s22  }
  0x2d   : > { %p745_p0 = scmp.ge.s32.totalorder %s533_s9, 1 }
  0x2f   : > { %p106_p2 = pnand %p745_p0, %p105_p9 }
  0x30   : > { %s653_s23 = sand.u32 (!%p106_p2), 1, %s525_s7  }
  0x31   : > { %109 = sbr.rel (%p106_p2) target bundleno = 104 (0x68), region = 24  ;;  %s112_s29 = scalar_lea.sflag (!%p106_p2), [#allocation3], %s653_s23 }
  0x32   : > { %s383_s26 = smul.u32 (!%p106_p2), 192, %s653_s23 }
  0x34   : > { %s657_s30 = scalar_lea.vmem (!%p106_p2), [#allocation2], %s383_s26 }
  0x38   : > { %512 = dma.done.wait (%p592_p6), %s112_s29, 3072  }
  0x39   : > { %514 = vsyncadd (%p592_p6), %s112_s29, 4294964224  ;;  %v134_v0 = vld [vmem:[%s657_s30] sm:$0xff]  ;;  %v357_v3 = vld [vmem:[%s657_s30 + $0x48] sm:$0xff]  ;;  %s384_s16 = smul.u32 24, %s653_s23  ;;  %s379_s24 = sshll.u32 %s574_s10, 7 }
  0x3a   : > { %v354_v1 = vld [vmem:[%s657_s30 + $0x40] sm:$0xff]  ;;  %v360_v4 = vld [vmem:[%s657_s30 + $0x50] sm:$0xff]  ;;  %v356_v5 = vld [vmem:[%s657_s30 + $0x8] sm:$0xff]  ;;  %v158_v6 = vsub.f32 1.0, %v357_v3  ;;  %s692_s3 = scalar_lea.hbm %s739_s1, %s379_s24  ;;  %s264_s4 = scalar_lea.sflag [#allocation4], %s653_s23 }
  0x3b   : > { %v144_v2 = vsub.f32 1.0, %v354_v1  ;;  %v173_v7 = vsub.f32 1.0, %v360_v4  ;;  %v363_v8 = vld [vmem:[%s657_s30 + $0x58] sm:$0xff]  ;;  %v139_v9 = vmul.f32 %v354_v1, %v134_v0  ;;  %v366_v13 = vld [vmem:[%s657_s30 + $0x60] sm:$0xff]  ;;  %v359_v16 = vld [vmem:[%s657_s30 + $0x10] sm:$0xff]  ;;  %s133_s25 = scalar_lea.vmem [#allocation5], %s384_s16 }
  0x3c   : > { %v188_v12 = vsub.f32 1.0, %v363_v8  ;;  %v355_v17 = vld [vmem:[%s657_s30 + $0x80] sm:$0xff]  ;;  %v358_v18 = vld [vmem:[%s657_s30 + $0x88] sm:$0xff]  ;;  %v361_v23 = vld [vmem:[%s657_s30 + $0x90] sm:$0xff]  ;;  %v203_v27 = vsub.f32 1.0, %v366_v13  ;;  %s276_s27 = sshll.u32 %s133_s25, 4  ;;  %s694_s27 = int_to_ptr.vmem [resolvable:$true] %s276_s27 }
  0x3d   : > { %v151_v10 = vmul.f32 %v357_v3, %v144_v2  ;;  %v159_v11 = vmul.f32 %v158_v6, %v144_v2  ;;  %v369_v21 = vld [vmem:[%s657_s30 + $0x68] sm:$0xff]  ;;  %v142_v22 = vmul.f32 %v355_v17, %v354_v1  ;;  %v362_v26 = vld [vmem:[%s657_s30 + $0x18] sm:$0xff]  ;;  %v372_v35 = vld [vmem:[%s657_s30 + $0x70] sm:$0xff]  ;;  %s467_s10 = scalar_lea.vmem %s694_s27, 384  ;;  %p746_p11 = scmp.ne.s32.totalorder %s742_s17, 0 }
  0x3e   : > { %v364_v33 = vld [vmem:[%s657_s30 + $0x98] sm:$0xff]  ;;  %v218_v34 = vsub.f32 1.0, %v369_v21  ;;  %v365_v42 = vld [vmem:[%s657_s30 + $0x20] sm:$0xff]  ;;  %v368_v51 = vld [vmem:[%s657_s30 + $0x28] sm:$0xff]  ;;  %v233_v52 = vsub.f32 1.0, %v372_v35  ;;  %p468_p6 = scmp.ne.s32.totalorder %s694_s27, %s467_s10  ;;  %s539_s5 = smov [#allocation5]  }
  0x3f   : > { %v152_v14 = vmul.f32 %v356_v5, %v151_v10  ;;  %v154_v15 = vmul.f32 2.0, %v151_v10  ;;  %v166_v19 = vmul.f32 %v360_v4, %v159_v11  ;;  %v174_v20 = vmul.f32 %v173_v7, %v159_v11  ;;  %v375_v45 = vld [vmem:[%s657_s30 + $0x78] sm:$0xff]  ;;  %v367_v48 = vld [vmem:[%s657_s30 + $0xa0] sm:$0xff]  ;;  %v370_v57 = vld [vmem:[%s657_s30 + $0xa8] sm:$0xff]  ;;  %s471_s11 = sshll.u32 %s539_s5, 4  ;;  %s472_s11 = int_to_ptr.vmem [resolvable:$false] %s471_s11 }
  0x40   : > { %v156_v28 = vmul.f32 %v358_v18, %v151_v10  ;;  %v248_v58 = vsub.f32 1.0, %v375_v45  ;;  %v373_v6 = vld [vmem:[%s657_s30 + $0xb0] sm:$0xff]  ;;  %p469_p12 = pnand %p468_p6, %p746_p11  ;;  %s473_s13 = scalar_lea.vmem %s472_s11, 768 }
  0x41   : > { %v153_v24 = vadd.f32 %v152_v14, %v139_v9  ;;  %v155_v25 = vadd.f32 %v354_v1, %v154_v15  ;;  %v167_v29 = vmul.f32 %v359_v16, %v166_v19  ;;  %v169_v30 = vmul.f32 3.0, %v166_v19  ;;  %v371_v1 = vld [vmem:[%s657_s30 + $0x30] sm:$0xff]  ;;  %v374_v9 = vld [vmem:[%s657_s30 + $0x38] sm:$0xff]  ;;  %p474_p4 = scmp.lt.s32.totalorder %s694_s27, %s472_s11  ;;  %p475_p10 = scmp.lt.s32.totalorder %s473_s13, %s467_s10 }
  0x42   : > { %v181_v31 = vmul.f32 %v363_v8, %v174_v20  ;;  %v189_v32 = vmul.f32 %v188_v12, %v174_v20  ;;  %v157_v36 = vadd.f32 %v156_v28, %v142_v22  ;;  %v171_v37 = vmul.f32 %v361_v23, %v166_v19  ;;  %v376_v14 = vld [vmem:[%s657_s30 + $0xb8] sm:$0xff]  ;;  %p470_p13 = pneg %p469_p12 }
  0x43   : > { %v168_v38 = vadd.f32 %v167_v29, %v153_v24  ;;  %v170_v39 = vadd.f32 %v169_v30, %v155_v25  ;;  %p476_p1 = por %p475_p10, %p474_p4 }
  0x44   : > { %v182_v40 = vmul.f32 %v362_v26, %v181_v31  ;;  %v184_v41 = vmul.f32 4.0, %v181_v31  ;;  %v196_v43 = vmul.f32 %v366_v13, %v189_v32  ;;  %v204_v44 = vmul.f32 %v203_v27, %v189_v32 }
  0x45   : > { %v172_v46 = vadd.f32 %v171_v37, %v157_v36  ;;  %v186_v47 = vmul.f32 %v364_v33, %v181_v31  ;;  %p477_p3 = pnand %p476_p1, %p470_p13 }
  0x46   : > { %v183_v49 = vadd.f32 %v182_v40, %v168_v38  ;;  %v185_v50 = vadd.f32 %v184_v41, %v170_v39  ;;  %v197_v53 = vmul.f32 %v365_v42, %v196_v43  ;;  %v199_v54 = vmul.f32 5.0, %v196_v43 }
  0x47   : > { %v211_v55 = vmul.f32 %v369_v21, %v204_v44  ;;  %v219_v56 = vmul.f32 %v218_v34, %v204_v44  ;;  %v187_v59 = vadd.f32 %v186_v47, %v172_v46  ;;  %v201_v60 = vmul.f32 %v367_v48, %v196_v43 }
  0x48   : > { %v198_v61 = vadd.f32 %v197_v53, %v183_v49  ;;  %v200_v62 = vadd.f32 %v199_v54, %v185_v50 }
  0x49   : > { %v212_v63 = vmul.f32 %v368_v51, %v211_v55  ;;  %v214_v0 = vmul.f32 6.0, %v211_v55  ;;  %v226_v2 = vmul.f32 %v372_v35, %v219_v56  ;;  %v234_v3 = vmul.f32 %v233_v52, %v219_v56 }
  0x4a   : > { %v202_v4 = vadd.f32 %v201_v60, %v187_v59  ;;  %v216_v5 = vmul.f32 %v370_v57, %v211_v55 }
  0x4b   : > { %v213_v7 = vadd.f32 %v212_v63, %v198_v61  ;;  %v215_v8 = vadd.f32 %v214_v0, %v200_v62  ;;  %v227_v10 = vmul.f32 %v371_v1, %v226_v2  ;;  %v229_v11 = vmul.f32 7.0, %v226_v2 }
  0x4c   : > { %v241_v12 = vmul.f32 %v375_v45, %v234_v3  ;;  %v249_v13 = vmul.f32 %v248_v58, %v234_v3  ;;  %v217_v15 = vadd.f32 %v216_v5, %v202_v4  ;;  %v231_v16 = vmul.f32 %v373_v6, %v226_v2 }
  0x4d   : > { %v228_v17 = vadd.f32 %v227_v10, %v213_v7  ;;  %v230_v18 = vadd.f32 %v229_v11, %v215_v8 }
  0x4e   : > { %v242_v19 = vmul.f32 %v374_v9, %v241_v12  ;;  %v244_v20 = vmul.f32 8.0, %v241_v12  ;;  %v250_v21 = vmul.f32 %v374_v9, %v249_v13  ;;  %v252_v22 = vmul.f32 8.0, %v249_v13 }
  0x4f   : > { %v232_v23 = vadd.f32 %v231_v16, %v217_v15  ;;  %v246_v24 = vmul.f32 %v376_v14, %v241_v12  ;;  %v254_v27 = vmul.f32 %v376_v14, %v249_v13 }
  0x50   : > { %v243_v25 = vadd.f32 %v242_v19, %v228_v17  ;;  %v245_v26 = vadd.f32 %v244_v20, %v230_v18 }
  0x51   : > { %v247_v28 = vadd.f32 %v246_v24, %v232_v23 }
  0x52   : > { %v251_v29 = vadd.f32 %v250_v21, %v243_v25  ;;  %v253_v30 = vadd.f32 %v252_v22, %v245_v26 }
  0x53   : > { %v255_v31 = vadd.f32 %v254_v27, %v247_v28 }
  0x54   : > { %v256_v32 = vmul.f32 0.01, %v253_v30  ;;  %377 = vst [vmem:[%s133_s25 + $0x8] sm:$0xff] %v253_v30 }
  0x55   : > { %378 = vst [vmem:[%s133_s25 + $0x10] sm:$0xff] %v255_v31 }
  0x56   : > { %v257_v33 = vadd.f32 %v256_v32, %v251_v29 }
  0x58   : > { %258 = vst [vmem:[%s133_s25] sm:$0xff] %v257_v33 }
  0x59   : > { %480 = shalt.err (!%p477_p3)
}
  0x5a   : > { %s481_s14 = scalar_lea.hbm %s692_s3, 384  ;;  %s485_s21 = scalar_lea.hbm %s739_s1, 768 }
  0x5b   : > { %p482_p5 = scmp.ne.s32.totalorder %s692_s3, %s481_s14  ;;  %p486_p9 = scmp.lt.u32.totalorder %s692_s3, %s739_s1 }
  0x5c   : > { %p487_p0 = scmp.lt.u32.totalorder %s485_s21, %s481_s14  ;;  %p489_p6 = scmp.lt.u32.totalorder %s481_s14, %s692_s3 }
  0x5d   : > { %p483_p7 = pnand %p482_p5, %p746_p11 }
  0x5e   : > { %p488_p2 = por %p487_p0, %p486_p9 }
  0x5f   : > { %p484_p8 = pneg %p483_p7 }
  0x60   : > { %p490_p12 = por %p489_p6, %p488_p2 }
  0x62   : > { %p491_p13 = pnand %p490_p12, %p484_p8 }
  0x64   : > { %494 = shalt.err (!%p491_p13)
}
  0x65   : > { %s540_s29 = smov 128   ;;  %s541_s30 = smov 256  }
  0x66   : > { %s542_s16 = smov 8  }
  0x67   : > { %387 = dma.vmem_to_hbm [thread:$0]  (%p746_p11), %s694_s27, 384, %s692_s3, %s264_s4, %s540_s29, %s541_s30, %s542_s16  }
  0x68 PF: > { %s291_s24 = sand.u32 1, %s521_s6   ;;  %p747_p4 = scmp.ne.s32.totalorder %s743_s18, 0 }
  0x69   : > { %p748_p10 = scmp.ge.s32.totalorder %s533_s9, 2  ;;  %s292_s25 = scalar_lea.sflag [#allocation4], %s291_s24 }
  0x6b   : > { %p394_p1 = pnand %p748_p10, %p747_p4 }
  0x6d   : > { %516 = dma.done.wait (!%p394_p1), %s292_s25, 384  }
  0x6e   : > { %518 = vsyncadd (!%p394_p1), %s292_s25, 4294966912  ;;  %p14_p3 = scmp.ge.s32.totalorder %s578_s12, 4   ;;  %s749_s6 = smov %s525_s7 }
  0x6f   : > { %s750_s7 = smov %s529_s8  ;;  %s751_s8 = smov %s590_s15 }
  0x70   : > { %s752_s9 = smov %s578_s12  ;;  %16 = sbr.rel (!%p14_p3) target bundleno = 5 (0x5), region = 94 }
  0x77   :  { %297 = vsyncpa [#allocation3], 1 }
  0x78   :  { %299 = vsyncpa [#allocation3 + $0x1], 1 }
  0x79   :  { %300 = vsyncpa [#allocation4], 1 }
  0x7a   :  { %302 = vsyncpa [#allocation4 + $0x1], 1 }

</bundles_post_ra>
